<compile_context>
chip_gen: v7x
topology: tpu7x:2x2x1
jax: 0.10.0
libtpu: 0.0.40
codegen_flags: <defaults>
</compile_context>

<pallas_src>
import jax
import jax.numpy as jnp
from jax.experimental import pallas as pl
from jax.experimental.pallas import tpu as pltpu

HP = 128  # hidden size padded to one full lane tile


# ----------------------------------------------------------------------------
# Kernels
# ----------------------------------------------------------------------------
def _lstm_cell_kernel(a_ref, w_ref, b_ref, c_ref, h_out_ref, c_out_ref):
    """Single-step cell. a = [x | h_prev | boundary], one fused matmul."""
    hp = h_out_ref.shape[-1]
    z = (jnp.dot(a_ref[...], w_ref[...], preferred_element_type=jnp.float32)
         + b_ref[...])                                   # (B, 4*hp)
    i = jax.nn.sigmoid(z[:, 0 * hp:1 * hp])
    f = jax.nn.sigmoid(z[:, 1 * hp:2 * hp])              # boundary already folded in
    o = jax.nn.sigmoid(z[:, 2 * hp:3 * hp])
    g = jnp.tanh(z[:, 3 * hp:4 * hp])
    c = f * c_ref[...] + i * g
    h_out_ref[...] = o * jnp.tanh(c)
    c_out_ref[...] = c


def _lstm_seq_kernel(xb_ref, wxb_ref, wh_ref, b_ref, h0_ref, c0_ref,
                     h_seq_ref, c_fin_ref, h_scr, c_scr):
    """Time loop inside one pallas_call: weights resident, h/c in VMEM scratch."""
    hp = h_scr.shape[-1]

    @pl.when(pl.program_id(0) == 0)
    def _():
        h_scr[...] = h0_ref[...]
        c_scr[...] = c0_ref[...]

    z = (jnp.dot(xb_ref[0], wxb_ref[...], preferred_element_type=jnp.float32)
         + jnp.dot(h_scr[...], wh_ref[...], preferred_element_type=jnp.float32)
         + b_ref[...])                                   # (B, 4*hp)
    i = jax.nn.sigmoid(z[:, 0 * hp:1 * hp])
    f = jax.nn.sigmoid(z[:, 1 * hp:2 * hp])
    o = jax.nn.sigmoid(z[:, 2 * hp:3 * hp])
    g = jnp.tanh(z[:, 3 * hp:4 * hp])
    c = f * c_scr[...] + i * g
    h = o * jnp.tanh(c)
    h_scr[...] = h
    c_scr[...] = c
    h_seq_ref[0] = h
    c_fin_ref[...] = c


# ----------------------------------------------------------------------------
# Wrappers
# ----------------------------------------------------------------------------
def custom_lstm_cell(x, hx, boundary, params):
    """Mirrors CustomLSTMCell.forward(x, hx, boundary) for one timestep."""
    h_prev, c_prev = hx
    B = x.shape[0]
    H = h_prev.shape[-1]
    hp = params["hp"]

    a = jnp.concatenate([x, h_prev, boundary], axis=1)       # (B, I+H+2)
    c_pad = jnp.pad(c_prev, ((0, 0), (0, hp - H)))           # (B, hp)
    K = a.shape[1]

    vmem = pl.BlockSpec(memory_space=pltpu.MemorySpace.VMEM)
    cost = pl.CostEstimate(
        flops=2 * B * K * 4 * hp,
        transcendentals=5 * B * hp,
        bytes_accessed=4 * (a.size + params["w_fused"].size
                            + params["b_all"].size + c_pad.size + 2 * B * hp))

    h_pad, c_new_pad = pl.pallas_call(
        _lstm_cell_kernel,
        out_shape=(jax.ShapeDtypeStruct((B, hp), jnp.float32),
                   jax.ShapeDtypeStruct((B, hp), jnp.float32)),
        in_specs=[vmem] * 4,
        out_specs=(vmem, vmem),
        cost_estimate=cost,
    )(a, params["w_fused"], params["b_all"], c_pad)
    return h_pad[:, :H], c_new_pad[:, :H]


def custom_lstm_sequence(xs, h0, c0, boundaries, params):
    """Runs the cell over T timesteps inside a single pallas_call."""
    T, B, I = xs.shape
    H = h0.shape[-1]
    hp = params["hp"]
    Kxb = I + 2

    xb = jnp.concatenate([xs, boundaries], axis=-1)          # (T, B, I+2)
    h0p = jnp.pad(h0, ((0, 0), (0, hp - H)))
    c0p = jnp.pad(c0, ((0, 0), (0, hp - H)))

    h_seq_p, c_fin_p = pl.pallas_call(
        _lstm_seq_kernel,
        grid=(T,),
        out_shape=(jax.ShapeDtypeStruct((T, B, hp), jnp.float32),
                   jax.ShapeDtypeStruct((B, hp), jnp.float32)),
        in_specs=[
            pl.BlockSpec((1, B, Kxb), lambda t: (t, 0, 0)),   # x_t | boundary_t
            pl.BlockSpec((Kxb, 4 * hp), lambda t: (0, 0)),    # weights stay resident
            pl.BlockSpec((hp, 4 * hp), lambda t: (0, 0)),
            pl.BlockSpec((1, 4 * hp), lambda t: (0, 0)),
            pl.BlockSpec((B, hp), lambda t: (0, 0)),          # h0
            pl.BlockSpec((B, hp), lambda t: (0, 0)),          # c0
        ],
        out_specs=(
            pl.BlockSpec((1, B, hp), lambda t: (t, 0, 0)),    # per-step h
            pl.BlockSpec((B, hp), lambda t: (0, 0)),          # final c
        ),
        scratch_shapes=[pltpu.VMEM((B, hp), jnp.float32),
                        pltpu.VMEM((B, hp), jnp.float32)],
        compiler_params=pltpu.CompilerParams(
            dimension_semantics=("arbitrary",)),
    )(xb, params["w_xb"], params["w_h"], params["b_all"], h0p, c0p)
    return h_seq_p[:, :, :H], c_fin_p[:, :H]


# ----------------------------------------------------------------------------
# Parameter construction (matches nn.Linear semantics: y = x @ W.T + b)
# ----------------------------------------------------------------------------
def init_params(key, input_size, hidden_size, hp=HP):
    H, I = hidden_size, input_size
    keys = jax.random.split(key, 18)
    k = iter(keys)

    def lin(kw, kb, out_dim, in_dim):
        w = jax.random.normal(kw, (out_dim, in_dim), jnp.float32) * 0.1
        b = jax.random.normal(kb, (out_dim,), jnp.float32) * 0.1
        return w, b

    W_i, b_Wi = lin(next(k), next(k), H, I)
    U_i, b_Ui = lin(next(k), next(k), H, H)
    W_f, b_Wf = lin(next(k), next(k), H, I)
    U_f, b_Uf = lin(next(k), next(k), H, H)
    W_o, b_Wo = lin(next(k), next(k), H, I)
    U_o, b_Uo = lin(next(k), next(k), H, H)
    W_g, b_Wg = lin(next(k), next(k), H, I)
    U_g, b_Ug = lin(next(k), next(k), H, H)
    W_b, b_Wb = lin(next(k), next(k), H, 2)

    def pad_cols(m):                       # (rows, H) -> (rows, hp)
        return jnp.pad(m, ((0, 0), (0, hp - H)))

    def pad_vec(v):                        # (H,) -> (hp,)
        return jnp.pad(v, (0, hp - H))

    # Gate order [i, f, o, g], each block hp lanes wide (zero-padded H..hp-1).
    wx = jnp.concatenate([pad_cols(W_i.T), pad_cols(W_f.T),
                          pad_cols(W_o.T), pad_cols(W_g.T)], axis=1)   # (I, 4hp)
    uh = jnp.concatenate([pad_cols(U_i.T), pad_cols(U_f.T),
                          pad_cols(U_o.T), pad_cols(U_g.T)], axis=1)   # (H, 4hp)
    z2 = jnp.zeros((2, hp), jnp.float32)
    wb_rows = jnp.concatenate([z2, pad_cols(W_b.T), z2, z2], axis=1)   # (2, 4hp) -> forget only

    # Fully fused weight for the single-step kernel: rows = [x | h_prev | boundary]
    w_fused = jnp.concatenate([wx, uh, wb_rows], axis=0)               # (I+H+2, 4hp)
    # Split packing for the sequence kernel (h comes from VMEM scratch):
    w_xb = jnp.concatenate([wx, wb_rows], axis=0)                      # (I+2, 4hp)
    w_h = jnp.pad(uh, ((0, hp - H), (0, 0)))                           # (hp, 4hp)

    # Fold all Linear biases; boundary bias goes ONLY into the forget slice.
    b_all = jnp.concatenate([pad_vec(b_Wi + b_Ui),
                             pad_vec(b_Wf + b_Uf + b_Wb),
                             pad_vec(b_Wo + b_Uo),
                             pad_vec(b_Wg + b_Ug)], axis=0)[None, :]   # (1, 4hp)

    params = dict(w_fused=w_fused, w_xb=w_xb, w_h=w_h, b_all=b_all, hp=hp)
    raw = dict(W_i=W_i, b_Wi=b_Wi, U_i=U_i, b_Ui=b_Ui,
               W_f=W_f, b_Wf=b_Wf, U_f=U_f, b_Uf=b_Uf,
               W_o=W_o, b_Wo=b_Wo, U_o=U_o, b_Uo=b_Uo,
               W_g=W_g, b_Wg=b_Wg, U_g=U_g, b_Ug=b_Ug,
               W_b=W_b, b_Wb=b_Wb)
    return params, raw


# ----------------------------------------------------------------------------
# Pure-JAX reference (replicates the PyTorch module exactly)
# ----------------------------------------------------------------------------
def reference_forward(x, hx, boundary, raw):
    h_prev, c_prev = hx

    def linear(v, w, b):
        return v @ w.T + b

    i = jax.nn.sigmoid(linear(x, raw["W_i"], raw["b_Wi"])
                       + linear(h_prev, raw["U_i"], raw["b_Ui"]))
    f_base = (linear(x, raw["W_f"], raw["b_Wf"])
              + linear(h_prev, raw["U_f"], raw["b_Uf"]))
    f = jax.nn.sigmoid(f_base + linear(boundary, raw["W_b"], raw["b_Wb"]))
    o = jax.nn.sigmoid(linear(x, raw["W_o"], raw["b_Wo"])
                       + linear(h_prev, raw["U_o"], raw["b_Uo"]))
    g = jnp.tanh(linear(x, raw["W_g"], raw["b_Wg"])
                 + linear(h_prev, raw["U_g"], raw["b_Ug"]))
    c = f * c_prev + i * g
    h = o * jnp.tanh(c)
    return h, c


if __name__ == "__main__":
    B, INPUT_SIZE, HIDDEN_SIZE, T = 8, 16, 32, 8

    key = jax.random.PRNGKey(0)
    ks = jax.random.split(key, 7)

    params, raw = init_params(ks[0], INPUT_SIZE, HIDDEN_SIZE)

    x = jax.random.normal(ks[1], (B, INPUT_SIZE), jnp.float32)
    h_prev = jax.random.normal(ks[2], (B, HIDDEN_SIZE), jnp.float32)
    c_prev = jax.random.normal(ks[3], (B, HIDDEN_SIZE), jnp.float32)
    boundary = jax.random.normal(ks[4], (B, 2), jnp.float32)

    # --- single-step cell (exact module semantics) ---
    h_out, c_out = custom_lstm_cell(x, (h_prev, c_prev), boundary, params)
    jax.block_until_ready((h_out, c_out))
    h_ref, c_ref = reference_forward(x, (h_prev, c_prev), boundary, raw)
    assert jnp.allclose(h_out, h_ref, atol=1e-5, rtol=1e-5), "h mismatch"
    assert jnp.allclose(c_out, c_ref, atol=1e-5, rtol=1e-5), "c mismatch"

    # --- sequence variant: time loop inside one pallas_call ---
    xs = jax.random.normal(ks[5], (T, B, INPUT_SIZE), jnp.float32)
    bnds = jax.random.normal(ks[6], (T, B, 2), jnp.float32)
    h_seq, c_fin = custom_lstm_sequence(xs, h_prev, c_prev, bnds, params)
    jax.block_until_ready((h_seq, c_fin))

    h_r, c_r = h_prev, c_prev
    hs = []
    for t in range(T):
        h_r, c_r = reference_forward(xs[t], (h_r, c_r), bnds[t], raw)
        hs.append(h_r)
    h_seq_ref = jnp.stack(hs, axis=0)
    assert jnp.allclose(h_seq, h_seq_ref, atol=1e-4, rtol=1e-4), "seq h mismatch"
    assert jnp.allclose(c_fin, c_r, atol=1e-4, rtol=1e-4), "seq c mismatch"

    print("KERNEL_OK")
</pallas_src>

<mosaic_0001>
module attributes {stable_mosaic.version = 11 : i64} {
  func.func @_lstm_cell_kernel(%arg0: memref<8x50xf32, #tpu.memory_space<vmem>>, %arg1: memref<50x512xf32, #tpu.memory_space<vmem>>, %arg2: memref<1x512xf32, #tpu.memory_space<vmem>>, %arg3: memref<8x128xf32, #tpu.memory_space<vmem>>, %arg4: memref<8x128xf32, #tpu.memory_space<vmem>>, %arg5: memref<8x128xf32, #tpu.memory_space<vmem>>) attributes {dimension_semantics = [], scalar_prefetch = 0 : i64, scratch_operands = 0 : i64, tpu.core_type = #tpu.core_type<tc>} {
    %c0 = arith.constant 0 : index
    %c0_0 = arith.constant 0 : index
    %0 = vector.load %arg0[%c0, %c0_0] : memref<8x50xf32, #tpu.memory_space<vmem>>, vector<8x50xf32>
    %c0_1 = arith.constant 0 : index
    %c0_2 = arith.constant 0 : index
    %1 = vector.load %arg1[%c0_1, %c0_2] : memref<50x512xf32, #tpu.memory_space<vmem>>, vector<50x512xf32>
    %cst = arith.constant dense<0.000000e+00> : vector<8x512xf32>
    %2 = tpu.matmul %0, %1, %cst {dimension_numbers = #tpu.dot_dimension_numbers<[1], [0], [0], [1], [0, 0, 1, 1], [], []>} : vector<8x50xf32>, vector<50x512xf32>, vector<8x512xf32> -> vector<8x512xf32>
    %c0_3 = arith.constant 0 : index
    %c0_4 = arith.constant 0 : index
    %3 = vector.load %arg2[%c0_3, %c0_4] : memref<1x512xf32, #tpu.memory_space<vmem>>, vector<1x512xf32>
    %4 = vector.broadcast %3 : vector<1x512xf32> to vector<8x512xf32>
    %5 = arith.addf %2, %4 : vector<8x512xf32>
    %6 = vector.extract_strided_slice %5 {offsets = [0, 0], sizes = [8, 128], strides = [1, 1]} : vector<8x512xf32> to vector<8x128xf32>
    %7 = arith.negf %6 : vector<8x128xf32>
    %8 = math.exp %7 : vector<8x128xf32>
    %cst_5 = arith.constant 1.000000e+00 : f32
    %9 = vector.broadcast %cst_5 : f32 to vector<8x128xf32>
    %10 = arith.addf %9, %8 : vector<8x128xf32>
    %11 = arith.divf %9, %10 : vector<8x128xf32>
    %12 = vector.extract_strided_slice %5 {offsets = [0, 128], sizes = [8, 128], strides = [1, 1]} : vector<8x512xf32> to vector<8x128xf32>
    %13 = arith.negf %12 : vector<8x128xf32>
    %14 = math.exp %13 : vector<8x128xf32>
    %cst_6 = arith.constant 1.000000e+00 : f32
    %15 = vector.broadcast %cst_6 : f32 to vector<8x128xf32>
    %16 = arith.addf %15, %14 : vector<8x128xf32>
    %17 = arith.divf %15, %16 : vector<8x128xf32>
    %18 = vector.extract_strided_slice %5 {offsets = [0, 256], sizes = [8, 128], strides = [1, 1]} : vector<8x512xf32> to vector<8x128xf32>
    %19 = arith.negf %18 : vector<8x128xf32>
    %20 = math.exp %19 : vector<8x128xf32>
    %cst_7 = arith.constant 1.000000e+00 : f32
    %21 = vector.broadcast %cst_7 : f32 to vector<8x128xf32>
    %22 = arith.addf %21, %20 : vector<8x128xf32>
    %23 = arith.divf %21, %22 : vector<8x128xf32>
    %24 = vector.extract_strided_slice %5 {offsets = [0, 384], sizes = [8, 128], strides = [1, 1]} : vector<8x512xf32> to vector<8x128xf32>
    %25 = math.tanh %24 : vector<8x128xf32>
    %c0_8 = arith.constant 0 : index
    %c0_9 = arith.constant 0 : index
    %26 = vector.load %arg3[%c0_8, %c0_9] : memref<8x128xf32, #tpu.memory_space<vmem>>, vector<8x128xf32>
    %27 = arith.mulf %17, %26 : vector<8x128xf32>
    %28 = arith.mulf %11, %25 : vector<8x128xf32>
    %29 = arith.addf %27, %28 : vector<8x128xf32>
    %30 = math.tanh %29 : vector<8x128xf32>
    %31 = arith.mulf %23, %30 : vector<8x128xf32>
    %c0_10 = arith.constant 0 : index
    %c0_11 = arith.constant 0 : index
    %32 = vector.load %arg4[%c0_10, %c0_11] : memref<8x128xf32, #tpu.memory_space<vmem>>, vector<8x128xf32>
    tpu.vector_store %arg4[%c0_10, %c0_11], %31 {strides = array<i32>} : memref<8x128xf32, #tpu.memory_space<vmem>>, vector<8x128xf32>,
    %c0_12 = arith.constant 0 : index
    %c0_13 = arith.constant 0 : index
    %33 = vector.load %arg5[%c0_12, %c0_13] : memref<8x128xf32, #tpu.memory_space<vmem>>, vector<8x128xf32>
    tpu.vector_store %arg5[%c0_12, %c0_13], %29 {strides = array<i32>} : memref<8x128xf32, #tpu.memory_space<vmem>>, vector<8x128xf32>,
    return
  }
}

</mosaic_0001>

<bundles_post_ra>
// kernel: tpu_custom_call.1
= control target key start
LH: loop header
LB: loop body
LE: loop exit
PB: predicated region body
PF: predicated region fallthrough
CT: control target
= control target key end

     0   :  { %11 = vsyncpa [#allocation3], 0  ;;  %s605_s0 = inlined_call_operand.hbm [shape: f32[8,50], index: 0, kind: input, shape index: {}]   ;;  %s606_s1 = inlined_call_operand.hbm [shape: f32[50,512], index: 1, kind: input, shape index: {}]   ;;  %s607_s2 = inlined_call_operand.hbm [shape: f32[1,512], index: 2, kind: input, shape index: {}]   ;;  %s608_s3 = inlined_call_operand.vmem [shape: f32[8,128], index: 3, kind: input, shape index: {}]   ;;  %s609_s4 = inlined_call_operand.hbm [shape: f32[8,128], index: 4, kind: output, shape index: {0}]   ;;  %s610_s5 = inlined_call_operand.hbm [shape: f32[8,128], index: 5, kind: output, shape index: {1}]  }
   0x1   :  { %12 = vsyncpa [#allocation6], 0 }
   0x2   :  { %13 = vsyncpa [#allocation4], 0 }
   0x3   :  { %14 = vsyncpa [#allocation10], 0  ;;  %s500_s18 = smov [#allocation5]   ;;  %s382_s22 = scalar_lea.hbm %s606_s1, 3584 }
   0x4   :  { %s30_s19 = sshll.u32 %s500_s18, 4  ;;  %p383_p0 = scmp.ne.s32.totalorder %s606_s1, %s382_s22  ;;  %s31_s19 = int_to_ptr.vmem [resolvable:$true] %s30_s19 }
   0x5   :  { %p386_p1 = scmp.lt.u32.totalorder %s382_s22, %s606_s1 }
   0x7   :  { %p388_p2 = pnand %p386_p1, %p383_p0 }
   0x9   :  { %391 = shalt.err (!%p388_p2)
}
   0xa   :  { %s392_s27 = scalar_lea.vmem %s31_s19, 3584  ;;  %p397_p4 = scmp.lt.s32.totalorder %s31_s19, %s31_s19 }
   0xb   :  { %p393_p3 = scmp.ne.s32.totalorder %s31_s19, %s392_s27  ;;  %p398_p5 = scmp.lt.s32.totalorder %s392_s27, %s392_s27 }
   0xd   :  { %p399_p6 = por %p398_p5, %p397_p4 }
   0xf   :  { %p400_p7 = pnand %p399_p6, %p393_p3 }
  0x11   :  { %403 = shalt.err (!%p400_p7)
}
  0x12   :  { %s501_s28 = smov 512   ;;  %s502_s29 = smov 32  }
  0x13   :  { %36 = dma.hbm_to_vmem [thread:$0]  %s606_s1, 3584, %s31_s19, [#allocation6], %s501_s28, %s501_s28, %s502_s29  }
  0x14   :  { %s503_s7 = smov [#allocation2]   ;;  %s504_s9 = smov [#allocation7]  }
  0x15   :  { %s21_s8 = sshll.u32 %s503_s7, 4  ;;  %s43_s10 = sshll.u32 %s504_s9, 4  ;;  %s22_s8 = int_to_ptr.vmem [resolvable:$true] %s21_s8  ;;  %s44_s10 = int_to_ptr.vmem [resolvable:$true] %s43_s10 }
  0x16   :  { %s404_s13 = scalar_lea.hbm %s605_s0, 128 }
  0x17   :  { %p405_p8 = scmp.ne.s32.totalorder %s605_s0, %s404_s13  ;;  %p408_p9 = scmp.lt.u32.totalorder %s404_s13, %s605_s0 }
  0x19   :  { %p410_p10 = pnand %p408_p9, %p405_p8 }
  0x1b   :  { %413 = shalt.err (!%p410_p10)
}
  0x1c   :  { %s414_s1 = scalar_lea.vmem %s22_s8, 128  ;;  %p419_p12 = scmp.lt.s32.totalorder %s22_s8, %s22_s8 }
  0x1d   :  { %p415_p11 = scmp.ne.s32.totalorder %s22_s8, %s414_s1  ;;  %p420_p13 = scmp.lt.s32.totalorder %s414_s1, %s414_s1 }
  0x1f   :  { %p421_p0 = por %p420_p13, %p419_p12 }
  0x21   :  { %p422_p1 = pnand %p421_p0, %p415_p11 }
  0x23   :  { %425 = shalt.err (!%p422_p1)
}
  0x24   :  { %24 = dma.hbm_to_vmem [thread:$0]  %s605_s0, 128, %s22_s8, [#allocation3]  }
  0x25   :  { %s426_s22 = scalar_lea.hbm %s607_s2, 64 }
  0x26   :  { %p427_p2 = scmp.ne.s32.totalorder %s607_s2, %s426_s22  ;;  %p430_p3 = scmp.lt.u32.totalorder %s426_s22, %s607_s2 }
  0x28   :  { %p432_p4 = pnand %p430_p3, %p427_p2 }
  0x2a   :  { %435 = shalt.err (!%p432_p4)
}
  0x2b   :  { %s436_s27 = scalar_lea.vmem %s44_s10, 64  ;;  %p441_p6 = scmp.lt.s32.totalorder %s44_s10, %s44_s10 }
  0x2c   :  { %p437_p5 = scmp.ne.s32.totalorder %s44_s10, %s436_s27  ;;  %p442_p7 = scmp.lt.s32.totalorder %s436_s27, %s436_s27 }
  0x2e   :  { %p443_p8 = por %p442_p7, %p441_p6 }
  0x30   :  { %p444_p9 = pnand %p443_p8, %p437_p5 }
  0x32   :  { %447 = shalt.err (!%p444_p9)
}
  0x33   :  { %46 = dma.hbm_to_vmem [thread:$0]  %s607_s2, 64, %s44_s10, [#allocation6]  }
  0x34   :  { %492 = dma.done.wait [#allocation3], 128  }
  0x35   :  { %493 = vsyncadd [#allocation3], 4294967168 }
  0x36   :  { %494 = dma.done.wait [#allocation6], 3648  }
  0x37   :  { %495 = vsyncadd [#allocation6], 4294963648  ;;  %v505_v0 = vmov 0.0   ;;  %v60_v1 = vld [vmem:[#allocation5 + $0x8] sm:$0xff]  ;;  %v59_v3 = vld [vmem:[#allocation5] sm:$0xff]  ;;  %vm113_vm0 = vcmask 1041408   ;;  %v89_v42 = vlaneseq }
  0x38   :  { %190 = vmatprep.mubr.f32.mxu0 %v505_v0  ;;  %261 = vmatprep.mubr.f32.mxu1 %v505_v0  ;;  %v64_v2 = vld [vmem:[#allocation5 + $0x28] sm:$0xff]  ;;  %v63_v5 = vld [vmem:[#allocation5 + $0x20] sm:$0xff]  ;;  %v62_v18 = vld [vmem:[#allocation5 + $0x18] sm:$0xff]  ;;  %vm109_vm1 = vcmask 408576   ;;  %s506_s30 = smov [#allocation9]  }
  0x39   :  { %v334_v4 = vpack.c.bf16 %v64_v2, %v60_v1  ;;  %v68_v6 = vld [vmem:[#allocation5 + $0x48] sm:$0xff]  ;;  %v336_v8 = vpack.c.bf16 %v63_v5, %v59_v3  ;;  %v67_v10 = vld [vmem:[#allocation5 + $0x40] sm:$0xff]  ;;  %v66_v19 = vld [vmem:[#allocation5 + $0x38] sm:$0xff]  ;;  %v90_v43 = vshrl.u32 %v89_v42, 7  ;;  %s311_s6 = sshll.u32 %s506_s30, 4  ;;  %s312_s6 = int_to_ptr.vmem [resolvable:$true] %s311_s6 }
  0x3a   :  { %v72_v7 = vld [vmem:[#allocation5 + $0x68] sm:$0xff]  ;;  %v71_v11 = vld [vmem:[#allocation5 + $0x60] sm:$0xff]  ;;  %v61_v20 = vld [vmem:[#allocation5 + $0x10] sm:$0xff]  ;;  %v346_v21 = vpack.c.bf16 %v66_v19, %v62_v18  ;;  %s448_s7 = scalar_lea.vmem %s312_s6, 128  ;;  %p453_p11 = scmp.lt.s32.totalorder %s312_s6, %s312_s6 }
  0x3b   :  { %v338_v9 = vpack.c.bf16 %v72_v7, %v68_v6  ;;  %v76_v12 = vld [vmem:[#allocation5 + $0x88] sm:$0xff]  ;;  %335 = vmatprep.subr.bf16.mxu0 %v334_v4  ;;  %v340_v14 = vpack.c.bf16 %v71_v11, %v67_v10  ;;  %v75_v15 = vld [vmem:[#allocation5 + $0x80] sm:$0xff]  ;;  %v65_v22 = vld [vmem:[#allocation5 + $0x30] sm:$0xff]  ;;  %v91_v44 = vsub.s32 0, %v90_v43  ;;  %v95_v46 = vsub.s32 1, %v90_v43  ;;  %p449_p10 = scmp.ne.s32.totalorder %s312_s6, %s448_s7  ;;  %p454_p12 = scmp.lt.s32.totalorder %s448_s7, %s448_s7 }
  0x3c   :  { %v80_v13 = vld [vmem:[#allocation5 + $0xa8] sm:$0xff]  ;;  %337 = vmatpush1.bf16.msra.mxu0 %v336_v8  ;;  %v79_v16 = vld [vmem:[#allocation5 + $0xa0] sm:$0xff]  ;;  %v70_v23 = vld [vmem:[#allocation5 + $0x58] sm:$0xff]  ;;  %v348_v25 = vpack.c.bf16 %v65_v22, %v61_v20  ;;  %347 = vmatprep.subr.bf16.mxu1 %v346_v21  ;;  %v99_v49 = vsub.s32 2, %v90_v43  ;;  %v103_v57 = vsub.s32 3, %v90_v43 }
  0x3d   :  { %339 = vmatprep.subr.bf16.mxu0 %v338_v9  ;;  %v342_v17 = vpack.c.bf16 %v80_v13, %v76_v12  ;;  %v74_v24 = vld [vmem:[#allocation5 + $0x78] sm:$0xff]  ;;  %v69_v27 = vld [vmem:[#allocation5 + $0x50] sm:$0xff]  ;;  %v344_v30 = vpack.c.bf16 %v79_v16, %v75_v15  ;;  %v84_v33 = vld [vmem:[#allocation5 + $0xc8] sm:$0x3]  ;;  %p455_p13 = por %p454_p12, %p453_p11 }
  0x3e   :  { %v350_v26 = vpack.c.bf16 %v74_v24, %v70_v23  ;;  %v73_v28 = vld [vmem:[#allocation5 + $0x70] sm:$0xff]  ;;  %v78_v29 = vld [vmem:[#allocation5 + $0x98] sm:$0xff]  ;;  %349 = vmatpush1.bf16.msra.mxu1 %v348_v25  ;;  %v83_v37 = vld [vmem:[#allocation5 + $0xc0] sm:$0x3] }
  0x3f   :  { %v82_v31 = vld [vmem:[#allocation5 + $0xb8] sm:$0xff]  ;;  %v352_v32 = vpack.c.bf16 %v73_v28, %v69_v27  ;;  %v77_v35 = vld [vmem:[#allocation5 + $0x90] sm:$0xff]  ;;  %v87_v45 = vld [vmem:[#allocation7] sm:$0xf]  ;;  %p456_p0 = pnand %p455_p13, %p449_p10 }
  0x40   :  { %341 = vmatpush1.bf16.msra.mxu0 %v340_v14  ;;  %351 = vmatprep.subr.bf16.mxu1 %v350_v26  ;;  %v354_v34 = vpack.c.bf16 %v82_v31, %v78_v29  ;;  %v81_v36 = vld [vmem:[#allocation5 + $0xb0] sm:$0xff]  ;;  %v58_v39 = vld [vmem:[#allocation2] sm:$0xff]  ;;  %v92_v47 = vrot.slane %v87_v45, %v91_v44  ;;  %v96_v48 = vrot.slane %v87_v45, %v95_v46 }
  0x41   :  { %343 = vmatprep.subr.bf16.mxu0 %v342_v17  ;;  %v356_v38 = vpack.c.bf16 %v81_v36, %v77_v35  ;;  %v86_v40 = vld [vmem:[#allocation5 + $0xd8] sm:$0x3]  ;;  %v85_v41 = vld [vmem:[#allocation5 + $0xd0] sm:$0x3]  ;;  %v100_v55 = vrot.slane %v87_v45, %v99_v49  ;;  %v104_v61 = vrot.slane %v87_v45, %v103_v57 }
  0x42   :  { %353 = vmatpush1.bf16.msra.mxu1 %v352_v32  ;;  %v287_v6 = vld [vmem:[%s608_s3] sm:$0xff] }
  0x43   :  { %355 = vmatprep.subr.bf16.mxu1 %v354_v34 }
  0x44   :  { %345 = vmatpush1.bf16.msra.mxu0 %v344_v30 }
  0x45   :  { %325 = vmatprep.subr.msk.mxu0 %vm113_vm0, %v84_v33 }
  0x46   :  { %357 = vmatpush1.bf16.msra.mxu1 %v356_v38 }
  0x47   :  { %328 = vmatprep.subr.msk.mxu1 %vm113_vm0, %v86_v40 }
  0x48   :  { %326 = vmatpush1.msk.msra.mxu0 %vm113_vm0, %v83_v37 }
  0x49   :  { %327 = vmatmul.mubr.msk.f32.vlgmr.msra.gmra.mrb[0].mxu0 %vm109_vm1, %v58_v39 }
  0x4a   :  { %329 = vmatpush1.msk.msra.mxu1 %vm113_vm0, %v85_v41 }
  0x4b   :  { %330 = vmatmul.mubr.msk.f32.vlgmr.msra.gmra.mrb[0].mxu1 %vm109_vm1, %v58_v39 }
 0x11c   :  { %v192_v50 = vpop.f32.mrb[0].mxu0 }
 0x11d   :  { %v193_v51 = vadd.f32 %v192_v50, %v92_v47  ;;  %v194_v52 = vpop.f32.mrb[1].mxu0 }
 0x11e   :  { %v195_v53 = vadd.f32 %v194_v52, %v96_v48  ;;  %v263_v58 = vpop.f32.mrb[0].mxu1 }
 0x11f   :  { %v331_v54 = vmul.f32 -1.442695, %v193_v51  ;;  %v265_v59 = vpop.f32.mrb[1].mxu1  ;;  %v264_v60 = vadd.f32 %v263_v58, %v100_v55 }
 0x120   :  { %v332_v56 = vmul.f32 -1.442695, %v195_v53  ;;  %v266_v63 = vadd.f32 %v265_v59, %v104_v61 }
 0x121   :  { %366 = vpow2.f32 %v331_v54  ;;  %v333_v62 = vmul.f32 -1.442695, %v264_v60 }
 0x122   :  { %368 = vpow2.f32 %v332_v56 }
 0x123   :  { %370 = vpow2.f32 %v333_v62 }
 0x124   :  { %372 = vtanh.f32 %v266_v63 }
 0x12b   :  { %v367_v0 = vpop.eup %366 }
 0x12c   :  { %v369_v1 = vpop.eup %368  ;;  %v271_v2 = vadd.f32 1.0, %v367_v0 }
 0x12d   :  { %v277_v3 = vadd.f32 1.0, %v369_v1  ;;  %v371_v4 = vpop.eup %370 }
 0x12e   :  { %374 = vrcp.f32 %v271_v2  ;;  %v373_v5 = vpop.eup %372  ;;  %v283_v8 = vadd.f32 1.0, %v371_v4 }
 0x12f   :  { %376 = vrcp.f32 %v277_v3 }
 0x130   :  { %378 = vrcp.f32 %v283_v8 }
 0x138   :  { %v375_v7 = vpop.eup %374 }
 0x139   :  { %v377_v9 = vpop.eup %376  ;;  %v289_v10 = vmul.f32 %v375_v7, %v373_v5 }
 0x13a   :  { %v288_v11 = vmul.f32 %v377_v9, %v287_v6 }
 0x13c   :  { %v290_v12 = vadd.f32 %v289_v10, %v288_v11 }
 0x13e   :  { %294 = vst [vmem:[#allocation9] sm:$0xff] %v290_v12  ;;  %380 = vtanh.f32 %v290_v12 }
 0x13f   :  { %459 = shalt.err (!%p456_p0)
}
 0x140   :  { %s460_s9 = scalar_lea.hbm %s610_s5, 128 }
 0x141   :  { %p461_p1 = scmp.ne.s32.totalorder %s610_s5, %s460_s9  ;;  %p464_p2 = scmp.lt.u32.totalorder %s460_s9, %s610_s5 }
 0x143   :  { %p466_p3 = pnand %p464_p2, %p461_p1 }
 0x145   :  { %469 = shalt.err (!%p466_p3)
}
 0x146   :  { %314 = dma.vmem_to_hbm [thread:$0]  %s312_s6, 128, %s610_s5, [#allocation10]   ;;  %v379_v13 = vpop.eup %378 }
 0x147   :  { %s507_s16 = smov [#allocation8]  }
 0x148   :  { %s301_s17 = sshll.u32 %s507_s16, 4  ;;  %v381_v14 = vpop.eup %380  ;;  %s302_s17 = int_to_ptr.vmem [resolvable:$true] %s301_s17 }
 0x149   :  { %v292_v15 = vmul.f32 %v381_v14, %v379_v13  ;;  %s470_s1 = scalar_lea.vmem %s302_s17, 128  ;;  %p475_p5 = scmp.lt.s32.totalorder %s302_s17, %s302_s17 }
 0x14a   :  { %p471_p4 = scmp.ne.s32.totalorder %s302_s17, %s470_s1  ;;  %p476_p6 = scmp.lt.s32.totalorder %s470_s1, %s470_s1 }
 0x14b   :  { %293 = vst [vmem:[#allocation8] sm:$0xff] %v292_v15 }
 0x14c   :  { %p477_p7 = por %p476_p6, %p475_p5 }
 0x14e   :  { %p478_p8 = pnand %p477_p7, %p471_p4 }
 0x150   :  { %481 = shalt.err (!%p478_p8)
}
 0x151   :  { %s482_s20 = scalar_lea.hbm %s609_s4, 128 }
 0x152   :  { %p483_p9 = scmp.ne.s32.totalorder %s609_s4, %s482_s20  ;;  %p486_p10 = scmp.lt.u32.totalorder %s482_s20, %s609_s4 }
 0x154   :  { %p488_p11 = pnand %p486_p10, %p483_p9 }
 0x156   :  { %491 = shalt.err (!%p488_p11)
}
 0x157   :  { %304 = dma.vmem_to_hbm [thread:$0]  %s302_s17, 128, %s609_s4, [#allocation4]  }
 0x158   :  { %496 = dma.done.wait [#allocation4], 128  }
 0x159   :  { %497 = vsyncadd [#allocation4], 4294967168 }
 0x15a   :  { %498 = dma.done.wait [#allocation10], 128  }
 0x15b   :  { %499 = vsyncadd [#allocation10], 4294967168 }
 0x15c   :  { %321 = vsyncpa [#allocation3], 1 }
 0x15d   :  { %322 = vsyncpa [#allocation6], 1 }
 0x15e   :  { %323 = vsyncpa [#allocation4], 1 }
 0x15f   :  { %324 = vsyncpa [#allocation10], 1 }

</bundles_post_ra>
